<compile_context>
chip_gen: v7x
topology: tpu7x:2x2x1
jax: 0.10.0
libtpu: 0.0.40
codegen_flags: <defaults>
</compile_context>

<pallas_src>
import math
import functools

import jax
import jax.numpy as jnp
from jax import lax
from jax.experimental import pallas as pl
from jax.experimental.pallas import tpu as pltpu


def _ceil_to(x, m):
    return -(-x // m) * m


def _chip_params():
    """Per-generation block-byte target / VMEM limit / megacore flag."""
    kind = ""
    try:
        kind = (getattr(jax.devices()[0], "device_kind", "") or "").lower()
    except Exception:
        pass
    if "v6" in kind:
        # v6e: 128 MiB VMEM, ~1.4 TB/s HBM -> big blocks amortize per-step overhead.
        return {"block_bytes": 8 << 20, "vmem_limit": 80 << 20, "two_core": False}
    if "v7" in kind or "7x" in kind:
        # v7x: only 64 MiB VMEM but 3.2 TB/s HBM and 2 TensorCores.
        return {"block_bytes": 5 << 20, "vmem_limit": 48 << 20, "two_core": True}
    # v5e / unknown: stay inside the default scoped-VMEM limit (16 MiB on v5e).
    return {"block_bytes": 2 << 20, "vmem_limit": None, "two_core": False}


def _choose_tiles(rows, hidden, dtype, params):
    """Pick (tm, tk, nk): row-tile, hidden-tile, number of reduction steps.

    Budget is computed on the *padded* VMEM tile: lanes round up to 128
    (tm is a multiple of 128, so sublane padding is already covered).
    """
    itemsize = jnp.dtype(dtype).itemsize
    block_bytes = params["block_bytes"]
    lane_hidden = _ceil_to(hidden, 128)          # lanes the tile really occupies
    rows_128 = _ceil_to(max(rows, 1), 128)

    # Preferred: a single reduction step (tk == full hidden).
    tm_max = (block_bytes // (lane_hidden * itemsize)) // 128 * 128
    if tm_max >= 128:
        tm = min(tm_max, rows_128, 32768)        # cap derived from the byte budget
        tk, nk = hidden, 1
    else:
        # hidden too wide for one block even at tm=256: tile the reduction axis.
        tm = 256
        tk = max(128, (block_bytes // (tm * itemsize)) // 128 * 128)
        tk = min(tk, lane_hidden)
        nk = -(-hidden // tk)

    # v7x: make sure the "parallel" row axis has >= 2 blocks so both TCs work.
    if params.get("two_core") and rows_128 >= 256:
        tm = min(tm, max(128, _ceil_to(rows_128 // 2, 128)))

    tm = max(128, min(tm, rows_128))
    if rows <= 128:
        tm = rows                                # full-extent row block (always legal)
    return tm, tk, nk


def _dot_sim_kernel(a_ref, b_ref, o_ref, acc_ref=None, *,
                    scale, hidden, tk, nk, precision):
    k = pl.program_id(1)

    # Elementwise product on the VPU in the native dtype.
    prod = a_ref[...] * b_ref[...]                              # (TM, TK)

    # Only needed when the hidden axis is tiled and does not divide evenly:
    # mask garbage lanes of the (padded) last reduction block.
    if nk > 1 and (hidden % tk) != 0:
        col = lax.broadcasted_iota(jnp.int32, prod.shape, dimension=1)
        prod = jnp.where(k * tk + col < hidden, prod, jnp.zeros_like(prod))

    # ones(1,TK) . prod(TM,TK)^T -> (1, TM): per-row sums, already lane-dense.
    ones_row = jnp.ones((1, prod.shape[1]), dtype=prod.dtype)
    partial = lax.dot_general(
        ones_row, prod,
        dimension_numbers=(((1,), (1,)), ((), ())),
        preferred_element_type=jnp.float32,
        precision=precision,
    )

    if nk == 1:
        # Single reduction step: bypass the accumulator scratch entirely.
        out = partial * scale if scale != 1.0 else partial
        o_ref[...] = out.astype(o_ref.dtype)
    else:
        @pl.when(k == 0)
        def _init():
            acc_ref[...] = jnp.zeros_like(acc_ref)

        acc_ref[...] += partial

        @pl.when(k == nk - 1)
        def _finalize():
            out = acc_ref[...]
            if scale != 1.0:
                out = out * scale
            o_ref[...] = out.astype(o_ref.dtype)


def dot_product_similarity(tensor_1, tensor_2, scale_output=False):
    assert tensor_1.shape == tensor_2.shape
    assert tensor_1.dtype == tensor_2.dtype
    *lead, hidden = tensor_1.shape
    rows = math.prod(lead) if lead else 1
    dtype = jnp.dtype(tensor_1.dtype)

    # Degenerate shapes.
    if rows == 0 or hidden == 0:
        return jnp.zeros(tuple(lead), dtype=tensor_1.dtype)

    # Explicit dtype guard: the kernel accumulates in f32 and casts back.
    if dtype not in (jnp.dtype(jnp.float32), jnp.dtype(jnp.bfloat16)):
        # TODO(synk): int / f16 / f64 inputs bypass the Pallas kernel (plain XLA).
        res = jnp.sum(tensor_1 * tensor_2, axis=-1)
        if scale_output:
            res = res / math.sqrt(hidden)
        return res

    a2 = tensor_1.reshape(rows, hidden)
    b2 = tensor_2.reshape(rows, hidden)

    params = _chip_params()
    tm, tk, nk = _choose_tiles(rows, hidden, dtype, params)
    scale = (1.0 / math.sqrt(hidden)) if scale_output else 1.0

    # bf16: default MXU precision is exact (f32 accumulation).
    # f32: HIGHEST keeps the products from being rounded to bf16 in the MXU.
    precision = lax.Precision.HIGHEST if dtype == jnp.dtype(jnp.float32) else None

    grid = (pl.cdiv(rows, tm), nk)               # reduction axis last
    scratch = [] if nk == 1 else [pltpu.VMEM((1, tm), jnp.float32)]

    cp_kwargs = dict(dimension_semantics=("parallel", "arbitrary"))
    if params["vmem_limit"] is not None:
        cp_kwargs["vmem_limit_bytes"] = params["vmem_limit"]

    out = pl.pallas_call(
        functools.partial(_dot_sim_kernel, scale=scale, hidden=hidden,
                          tk=tk, nk=nk, precision=precision),
        out_shape=jax.ShapeDtypeStruct((1, rows), tensor_1.dtype),
        grid=grid,
        in_specs=[
            pl.BlockSpec((tm, tk), lambda i, k: (i, k)),
            pl.BlockSpec((tm, tk), lambda i, k: (i, k)),
        ],
        out_specs=pl.BlockSpec((1, tm), lambda i, k: (0, i)),
        scratch_shapes=scratch,
        compiler_params=pltpu.CompilerParams(**cp_kwargs),
    )(a2, b2)

    out = out.reshape(rows)
    return out.reshape(tuple(lead)) if lead else out.reshape(())


if __name__ == "__main__":
    key = jax.random.PRNGKey(0)
    k1, k2, k3, k4 = jax.random.split(key, 4)

    # small shapes consistent with the module: batch=2, seq=8, hidden=32
    t1 = jax.random.normal(k1, (2, 8, 32), dtype=jnp.float32)
    t2 = jax.random.normal(k2, (2, 8, 32), dtype=jnp.float32)

    out = jax.block_until_ready(dot_product_similarity(t1, t2, scale_output=False))
    out_scaled = jax.block_until_ready(dot_product_similarity(t1, t2, scale_output=True))

    ref = jnp.sum(t1 * t2, axis=-1)
    ref_scaled = ref / math.sqrt(t1.shape[-1])
    assert out.shape == (2, 8)
    assert out_scaled.shape == (2, 8)
    assert jnp.allclose(out, ref, atol=1e-4, rtol=1e-4)
    assert jnp.allclose(out_scaled, ref_scaled, atol=1e-4, rtol=1e-4)

    # non-divisible leading dims exercise the edge-block path (no wrapper pad)
    u1 = jax.random.normal(k3, (3, 5, 32), dtype=jnp.float32)
    u2 = jax.random.normal(k4, (3, 5, 32), dtype=jnp.float32)
    out2 = jax.block_until_ready(dot_product_similarity(u1, u2))
    assert out2.shape == (3, 5)
    assert jnp.allclose(out2, jnp.sum(u1 * u2, axis=-1), atol=1e-4, rtol=1e-4)

    # bf16 path (default MXU precision, f32 accumulate, cast back to bf16)
    b1 = t1.astype(jnp.bfloat16)
    b2 = t2.astype(jnp.bfloat16)
    outb = jax.block_until_ready(dot_product_similarity(b1, b2))
    refb = jnp.sum(b1.astype(jnp.float32) * b2.astype(jnp.float32), axis=-1)
    assert outb.dtype == jnp.bfloat16
    assert jnp.allclose(outb.astype(jnp.float32), refb, atol=0.5, rtol=0.05)

    print("KERNEL_OK")
</pallas_src>

<mosaic_0001>
module attributes {stable_mosaic.version = 11 : i64} {
  func.func @_dot_sim_kernel(%arg0: i32, %arg1: i32, %arg2: memref<16x32xf32, #tpu.memory_space<vmem>>, %arg3: memref<16x32xf32, #tpu.memory_space<vmem>>, %arg4: memref<1x16xf32, #tpu.memory_space<vmem>>) attributes {dimension_semantics = [#tpu.dimension_semantics<parallel>, #tpu.dimension_semantics<arbitrary>], iteration_bounds = array<i64: 1, 1>, scalar_prefetch = 0 : i64, scratch_operands = 0 : i64, tpu.core_type = #tpu.core_type<tc>, window_params = [{transform_indices = @transform_0, window_bounds = array<i64: 16, 32>}, {transform_indices = @transform_1, window_bounds = array<i64: 16, 32>}, {transform_indices = @transform_2, window_bounds = array<i64: 1, 16>}]} {
    %c0 = arith.constant 0 : index
    %c0_0 = arith.constant 0 : index
    %0 = vector.load %arg2[%c0, %c0_0] : memref<16x32xf32, #tpu.memory_space<vmem>>, vector<16x32xf32>
    %c0_1 = arith.constant 0 : index
    %c0_2 = arith.constant 0 : index
    %1 = vector.load %arg3[%c0_1, %c0_2] : memref<16x32xf32, #tpu.memory_space<vmem>>, vector<16x32xf32>
    %2 = arith.mulf %0, %1 : vector<16x32xf32>
    %cst = arith.constant 1.000000e+00 : f32
    %3 = vector.broadcast %cst : f32 to vector<1x32xf32>
    %cst_3 = arith.constant dense<0.000000e+00> : vector<1x16xf32>
    %4 = tpu.matmul %3, %2, %cst_3 {dimension_numbers = #tpu.dot_dimension_numbers<[1], [1], [0], [0], [0, 0, 1, 0], [], []>, precision = #tpu.contract_precision<fp32>} : vector<1x32xf32>, vector<16x32xf32>, vector<1x16xf32> -> vector<1x16xf32>
    %c0_4 = arith.constant 0 : index
    %c0_5 = arith.constant 0 : index
    %5 = vector.load %arg4[%c0_4, %c0_5] : memref<1x16xf32, #tpu.memory_space<vmem>>, vector<1x16xf32>
    tpu.vector_store %arg4[%c0_4, %c0_5], %4 {strides = array<i32>} : memref<1x16xf32, #tpu.memory_space<vmem>>, vector<1x16xf32>,
    return
  }
  func.func @transform_0(%arg0: i32, %arg1: i32) -> (i32, i32) {
    %c0_i32 = arith.constant 0 : i32
    return %arg0, %arg1 : i32, i32
  }
  func.func @transform_1(%arg0: i32, %arg1: i32) -> (i32, i32) {
    %c0_i32 = arith.constant 0 : i32
    return %arg0, %arg1 : i32, i32
  }
  func.func @transform_2(%arg0: i32, %arg1: i32) -> (i32, i32) {
    %c0_i32 = arith.constant 0 : i32
    %c0_i32_0 = arith.constant 0 : i32
    return %c0_i32, %arg0 : i32, i32
  }
}

</mosaic_0001>

<bundles_post_ra>
// kernel: tpu_custom_call.1
= control target key start
LH: loop header
LB: loop body
LE: loop exit
PB: predicated region body
PF: predicated region fallthrough
CT: control target
= control target key end

     0   :  { %7 = vsyncpa [#allocation3], 0  ;;  %s778_s0 = inlined_call_operand.hbm [shape: f32[16,32], index: 0, kind: input, shape index: {}]   ;;  %s779_s1 = inlined_call_operand.hbm [shape: f32[16,32], index: 1, kind: input, shape index: {}]   ;;  %s780_s2 = inlined_call_operand.hbm [shape: f32[1,16], index: 2, kind: output, shape index: {}]  }
   0x1   :  { %8 = vsyncpa [#allocation6], 0 }
   0x2   :  { %9 = vsyncpa [#allocation4], 0  ;;  %s705_s9 = smov [#allocation2]   ;;  %s633_s13 = scalar_lea.hbm %s778_s0, 256 }
   0x3   :  { %s15_s10 = sshll.u32 %s705_s9, 4  ;;  %p634_p0 = scmp.ne.s32.totalorder %s778_s0, %s633_s13  ;;  %s16_s10 = int_to_ptr.vmem [resolvable:$true] %s15_s10 }
   0x4   :  { %p637_p1 = scmp.lt.u32.totalorder %s633_s13, %s778_s0 }
   0x6   :  { %p639_p2 = pnand %p637_p1, %p634_p0 }
   0x8   :  { %642 = shalt.err (!%p639_p2)
}
   0x9   :  { %s643_s18 = scalar_lea.vmem %s16_s10, 256  ;;  %p648_p4 = scmp.lt.s32.totalorder %s16_s10, %s16_s10 }
   0xa   :  { %p644_p3 = scmp.ne.s32.totalorder %s16_s10, %s643_s18  ;;  %p649_p5 = scmp.lt.s32.totalorder %s643_s18, %s643_s18 }
   0xc   :  { %p650_p6 = por %p649_p5, %p648_p4 }
   0xe   :  { %p651_p7 = pnand %p650_p6, %p644_p3 }
  0x10   :  { %654 = shalt.err (!%p651_p7)
}
  0x11   :  { %s706_s19 = smov 128   ;;  %s707_s20 = smov 8  }
  0x12   :  { %21 = dma.hbm_to_vmem [thread:$0]  %s778_s0, 256, %s16_s10, [#allocation3], %s706_s19, %s706_s19, %s707_s20  }
  0x13   :  { %s708_s23 = smov [#allocation5]   ;;  %s655_s27 = scalar_lea.hbm %s779_s1, 256 }
  0x14   :  { %s27_s24 = sshll.u32 %s708_s23, 4  ;;  %p656_p8 = scmp.ne.s32.totalorder %s779_s1, %s655_s27  ;;  %s28_s24 = int_to_ptr.vmem [resolvable:$true] %s27_s24 }
  0x15   :  { %p659_p9 = scmp.lt.u32.totalorder %s655_s27, %s779_s1 }
  0x17   :  { %p661_p10 = pnand %p659_p9, %p656_p8 }
  0x19   :  { %664 = shalt.err (!%p661_p10)
}
  0x1a   :  { %s665_s4 = scalar_lea.vmem %s28_s24, 256  ;;  %p670_p12 = scmp.lt.s32.totalorder %s28_s24, %s28_s24 }
  0x1b   :  { %p666_p11 = scmp.ne.s32.totalorder %s28_s24, %s665_s4  ;;  %p671_p13 = scmp.lt.s32.totalorder %s665_s4, %s665_s4 }
  0x1d   :  { %p672_p0 = por %p671_p13, %p670_p12 }
  0x1f   :  { %p673_p1 = pnand %p672_p0, %p666_p11 }
  0x21   :  { %676 = shalt.err (!%p673_p1)
}
  0x22   :  { %33 = dma.hbm_to_vmem [thread:$0]  %s779_s1, 256, %s28_s24, [#allocation6], %s706_s19, %s706_s19, %s707_s20  }
  0x23   :  { %699 = dma.done.wait [#allocation3], 256  }
  0x24   :  { %700 = vsyncadd [#allocation3], 4294967040 }
  0x25   :  { %701 = dma.done.wait [#allocation6], 256  }
  0x26   :  { %702 = vsyncadd [#allocation6], 4294967040  ;;  %v709_v0 = vmov 0.0|0.0   ;;  %vm710_vm0 = vmmov 0   ;;  %v711_v1 = vmov 0.0   ;;  %vm46_vm1 = vcmask 261120  }
  0x27   :  { %596 = vmatprep.subr.bf16.mxu1 %v709_v0  ;;  %605 = vmatprep.subr.bf16.mxu0 %v709_v0  ;;  %v712_v2 = vmov 0   ;;  %v40_v4 = vld [vmem:[#allocation2] sm:$0xff]  ;;  %v41_v5 = vld [vmem:[#allocation2 + $0x8] sm:$0xff]  ;;  %v42_v6 = vld [vmem:[#allocation5] sm:$0xff]  ;;  %v713_v30 = vmov 1.0   ;;  %s714_s1 = smov [#allocation7]  }
  0x28   :  { %558 = vmatprep.mubr.msk.f32.mxu1 %vm710_vm0, %v711_v1  ;;  %579 = vmatprep.mubr.msk.f32.mxu0 %vm710_vm0, %v711_v1  ;;  %v48_v3 = vsel %vm46_vm1, 1.0, %v712_v2  ;;  %v43_v8 = vld [vmem:[#allocation5 + $0x8] sm:$0xff]  ;;  %v44_v9 = vmul.f32 %v42_v6, %v40_v4  ;;  %s523_s6 = sshll.u32 %s714_s1, 4  ;;  %vm515_vm2 = vcmask 122880   ;;  %s524_s6 = int_to_ptr.vmem [resolvable:$true] %s523_s6 }
  0x29   :  { %v124_v7 = vsub.f32 %v48_v3, %v48_v3  ;;  %v45_v10 = vmul.f32 %v43_v8, %v41_v5  ;;  %s677_s7 = scalar_lea.vmem %s524_s6, 16  ;;  %s681_s8 = scalar_lea.vmem %s524_s6, 32 }
  0x2a   :  { %v51_v11 = vsel %vm46_vm1, %v44_v9, 0  ;;  %p678_p2 = scmp.ne.s32.totalorder %s524_s6, %s677_s7  ;;  %p682_p3 = scmp.lt.s32.totalorder %s524_s6, %s524_s6 }
  0x2b   :  { %v54_v12 = vsel %vm46_vm1, %v45_v10, 0  ;;  %v57_v13 = vand.u32 4294901760, %v51_v11  ;;  %v125_v14 = vand.u32 4294901760, %v124_v7  ;;  %p683_p4 = scmp.lt.s32.totalorder %s681_s8, %s677_s7 }
  0x2c   :  { %v60_v15 = vand.u32 4294901760, %v54_v12 }
  0x2d   :  { %v135_v16 = vsub.f32 %v51_v11, %v57_v13  ;;  %v126_v19 = vsub.f32 %v124_v7, %v125_v14  ;;  %p684_p5 = por %p683_p4, %p682_p3 }
  0x2e   :  { %v597_v17 = vpack.c.bf16 %v60_v15, %v57_v13  ;;  %v142_v18 = vsub.f32 %v54_v12, %v60_v15 }
  0x2f   :  { %v136_v20 = vand.u32 4294901760, %v135_v16  ;;  %v127_v24 = vand.u32 4294901760, %v126_v19  ;;  %p685_p6 = pnand %p684_p5, %p678_p2 }
  0x30   :  { %598 = vmatpush3.bf16.xpose.msra.mxu1 %v597_v17  ;;  %607 = vmatpush3.bf16.xpose.msra.mxu0 %v597_v17  ;;  %v143_v21 = vand.u32 4294901760, %v142_v18  ;;  %v603_v29 = vpack.c.bf16 %v142_v18, %v135_v16 }
  0x31   :  { %599 = vmatprep.subr.bf16.mxu1 %v709_v0  ;;  %608 = vmatprep.subr.bf16.mxu0 %v709_v0  ;;  %v137_v22 = vsub.f32 %v135_v16, %v136_v20 }
  0x32   :  { %v144_v23 = vsub.f32 %v142_v18, %v143_v21  ;;  %v609_v27 = vpack.c.bf16 %v143_v21, %v136_v20 }
  0x33   :  { %v138_v25 = vand.u32 4294901760, %v137_v22 }
  0x34   :  { %v145_v26 = vand.u32 4294901760, %v144_v23 }
  0x36   :  { %v600_v28 = vpack.c.bf16 %v145_v26, %v138_v25 }
  0x37   :  { %559 = vmatmul.mubr.f32.vlgmr.msra.gmra.mrb[0].mxu1 %v127_v24  ;;  %580 = vmatmul.mubr.f32.vlgmr.msra.gmra.mrb[0].mxu0 %v125_v14 }
  0x38   :  { %601 = vmatpush3.bf16.xpose.msra.mxu1 %v600_v28  ;;  %610 = vmatpush3.bf16.xpose.msra.mxu0 %v609_v27 }
  0x39   :  { %565 = vmatprep.mubr.msk.f32.mxu1 %vm710_vm0, %v711_v1  ;;  %586 = vmatprep.mubr.msk.f32.mxu0 %vm710_vm0, %v711_v1 }
  0x3a   :  { %602 = vmatprep.subr.bf16.mxu1 %v709_v0  ;;  %611 = vmatprep.subr.bf16.mxu0 %v709_v0 }
  0x3f   :  { %566 = vmatmul.mubr.msk.f32.vlgmr.msra.gmra.mrb[0].mxu1 %vm46_vm1, %v713_v30  ;;  %587 = vmatmul.mubr.msk.f32.vlgmr.msra.gmra.mrb[0].mxu0 %vm46_vm1, %v713_v30 }
  0x40   :  { %604 = vmatpush3.bf16.xpose.msra.mxu1 %v603_v29  ;;  %613 = vmatpush3.bf16.xpose.msra.mxu0 %v597_v17 }
  0x41   :  { %572 = vmatprep.mubr.msk.f32.mxu1 %vm710_vm0, %v711_v1  ;;  %593 = vmatprep.mubr.msk.f32.mxu0 %vm710_vm0, %v711_v1 }
  0x47   :  { %573 = vmatmul.mubr.f32.vlgmr.msra.gmra.mrb[0].mxu1 %v124_v7  ;;  %594 = vmatmul.mubr.msk.f32.vlgmr.msra.gmra.mrb[0].mxu0 %vm46_vm1, %v713_v30 }
 0x11a   :  { %v286_v31 = vpop.f32.mrb[0].mxu1  ;;  %v511_v32 = vpop.f32.mrb[0].mxu0 }
 0x11b   :  { %v614_v33 = vadd.f32 %v511_v32, %v286_v31  ;;  %v574_v34 = vpop.f32.mrb[1].mxu1  ;;  %v595_v35 = vpop.f32.mrb[1].mxu0 }
 0x11d   :  { %516 = vst.msk [vmem:[#allocation7] sm:$0x1] %vm515_vm2, %v614_v33 }
 0x11e   :  { %688 = shalt.err (!%p685_p6)
}
 0x11f   :  { %s689_s11 = scalar_lea.hbm %s780_s2, 16 }
 0x120   :  { %p690_p7 = scmp.ne.s32.totalorder %s780_s2, %s689_s11  ;;  %p693_p8 = scmp.lt.u32.totalorder %s689_s11, %s780_s2 }
 0x122   :  { %p695_p9 = pnand %p693_p8, %p690_p7 }
 0x124   :  { %698 = shalt.err (!%p695_p9)
}
 0x125   :  { %526 = dma.vmem_to_hbm [thread:$0]  %s524_s6, 16, %s780_s2, [#allocation4]  }
 0x126   :  { %703 = dma.done.wait [#allocation4], 16  }
 0x127   :  { %704 = vsyncadd [#allocation4], 4294967280 }
 0x128   :  { %530 = vsyncpa [#allocation3], 1 }
 0x129   :  { %531 = vsyncpa [#allocation6], 1 }
 0x12a   :  { %532 = vsyncpa [#allocation4], 1 }

</bundles_post_ra>
